<compile_context>
chip_gen: v5e
topology: v5e:2x2
jax: 0.10.0
libtpu: 0.0.40
codegen_flags: <defaults>
</compile_context>

<pallas_src>
import jax
import jax.numpy as jnp
from jax.experimental import pallas as pl
from jax.experimental.pallas import tpu as pltpu


def linear_mixer_kernel(w_ref, b_ref, x_ref, o_ref, acc_ref):
    """All depth blocks applied to one (T, tile_n) activation slab.

    w_ref:   (T, T)          pre-masked mixing weights for block d: tril(W) + I (residual folded in)
    b_ref:   (depth, T, 1)   all biases, resident in VMEM (constant block index -> fetched once)
    x_ref:   (T, tile_n)     input activation slab (batch folded into lanes)
    o_ref:   (T, tile_n)     output slab
    acc_ref: (T, tile_n) f32 VMEM scratch, resident across the depth grid axis
    """
    d = pl.program_id(1)

    @pl.when(d == 0)
    def _():
        acc_ref[...] = x_ref[...].astype(jnp.float32)

    # (tril(W) + I) @ x + b  ==  tril(W) @ x + x + b   (residual handled by the MXU)
    y = jnp.dot(w_ref[...], acc_ref[...], preferred_element_type=jnp.float32)
    acc_ref[...] = y + b_ref[d]                         # bias (T, 1) broadcasts over lanes

    @pl.when(d == pl.num_programs(1) - 1)
    def _():
        o_ref[...] = acc_ref[...].astype(o_ref.dtype)


def _pick_tile_n(n):
    """Largest lane-dense (multiple-of-128) tile of N = B*D that divides n, preferring >= 2 tiles
    so the parallel grid axis can be sharded across v7x's two TensorCores."""
    if n % 128 != 0:
        return n                       # full-extent block is always legal
    tile = next((t for t in (512, 384, 256, 128) if n % t == 0), n)
    if tile == n and n // 128 >= 2:
        tile = n // 2 if (n // 2) % 128 == 0 else 128
    return tile


def linear_mixer_blocks(x, w_stack, b_stack):
    """x: (B, T, D), w_stack: (depth, T, T) (tril + I already applied), b_stack: (depth, T, 1)."""
    B, T, D = x.shape
    depth = w_stack.shape[0]
    N = B * D
    # Fold batch into lanes: (B, T, D) -> (T, B*D). One transpose in, one out (tiny XLA-side glue).
    x2 = jnp.transpose(x, (1, 0, 2)).reshape(T, N)
    tile_n = _pick_tile_n(N)
    n_tiles = N // tile_n

    out2 = pl.pallas_call(
        linear_mixer_kernel,
        out_shape=jax.ShapeDtypeStruct((T, N), x.dtype),
        grid_spec=pltpu.PrefetchScalarGridSpec(
            num_scalar_prefetch=0,
            grid=(n_tiles, depth),
            in_specs=[
                # Per-block weight; leading depth dim squeezed out of the kernel ref.
                pl.BlockSpec((pl.Squeezed(), T, T), lambda n, d: (d, 0, 0)),
                # All biases resident (block index never changes).
                pl.BlockSpec((depth, T, 1), lambda n, d: (0, 0, 0)),
                # Activation slab: block index constant across d -> fetched once per n tile.
                pl.BlockSpec((T, tile_n), lambda n, d: (0, n)),
            ],
            out_specs=pl.BlockSpec((T, tile_n), lambda n, d: (0, n)),
            scratch_shapes=[pltpu.VMEM((T, tile_n), jnp.float32)],
        ),
        compiler_params=pltpu.CompilerParams(
            dimension_semantics=("parallel", "arbitrary")),
    )(w_stack, b_stack, x2)

    return out2.reshape(T, B, D).transpose(1, 0, 2)


def linear_mixer_forward(input_ids, wte, block_weights, block_biases):
    """input_ids: (B, T) int32 -> (B, T, D) float32.

    Embedding gather, the one-time weight preprocessing (tril mask + identity for the residual),
    and the layout transpose are plain-JAX glue; all depth token-mixing blocks (matmul + bias +
    residual) run inside a single fused Pallas kernel.
    """
    x = jnp.take(wte, input_ids, axis=0)                       # (B, T, D)
    T = x.shape[1]
    w_stack = jnp.tril(jnp.stack(block_weights, axis=0))       # (depth, T, T), causal mask
    w_stack = w_stack + jnp.eye(T, dtype=w_stack.dtype)[None]  # fold residual into the matmul
    b_stack = jnp.stack(block_biases, axis=0)                  # (depth, T, 1)
    return linear_mixer_blocks(x, w_stack, b_stack)
    # TODO(synk): lm_head + CrossEntropyLoss branch (labels is not None) not exercised here,
    # matching the labels=None forward path which returns the hidden states.


if __name__ == "__main__":
    # Small, deterministic configuration consistent with the module.
    n_vocab = 1000
    tokenized_length = 64   # T
    dim = 128               # D
    depth = 2
    batch = 2

    key = jax.random.PRNGKey(0)
    k_emb, k_ids, *k_blocks = jax.random.split(key, 2 + 2 * depth)

    wte = jax.random.normal(k_emb, (n_vocab, dim), dtype=jnp.float32) * 0.02
    input_ids = jax.random.randint(k_ids, (batch, tokenized_length), 0, n_vocab, dtype=jnp.int32)

    # Conv1d(length, length, 1): weight (T, T, 1) -> squeeze to (T, T); bias (T,) -> (T, 1).
    block_weights = []
    block_biases = []
    for i in range(depth):
        kw, kb = k_blocks[2 * i], k_blocks[2 * i + 1]
        fan_in = float(tokenized_length)
        bound = 1.0 / (fan_in ** 0.5)
        w = jax.random.uniform(kw, (tokenized_length, tokenized_length),
                               minval=-bound, maxval=bound, dtype=jnp.float32)
        b = jax.random.uniform(kb, (tokenized_length, 1),
                               minval=-bound, maxval=bound, dtype=jnp.float32)
        block_weights.append(w)
        block_biases.append(b)

    out = linear_mixer_forward(input_ids, wte, block_weights, block_biases)
    out = jax.block_until_ready(out)

    # Pure-JAX reference check of the same semantics (explicit residual, un-folded weights).
    x_ref = jnp.take(wte, input_ids, axis=0)
    for w, b in zip(block_weights, block_biases):
        wm = jnp.tril(w)
        x_ref = jnp.einsum("ij,bjd->bid", wm, x_ref) + b[None, :, :] + x_ref
    assert out.shape == (batch, tokenized_length, dim)
    assert jnp.allclose(out, x_ref, atol=1e-4, rtol=1e-4), "mismatch vs reference"

    print("KERNEL_OK")
</pallas_src>

<mosaic_0001>
module attributes {stable_mosaic.version = 11 : i64} {
  func.func @linear_mixer_kernel(%arg0: i32, %arg1: i32, %arg2: memref<1x64x64xf32, #tpu.memory_space<vmem>>, %arg3: memref<2x64x1xf32, #tpu.memory_space<vmem>>, %arg4: memref<64x128xf32, #tpu.memory_space<vmem>>, %arg5: memref<64x128xf32, #tpu.memory_space<vmem>>, %arg6: memref<64x128xf32, #tpu.memory_space<vmem>>) attributes {dimension_semantics = [#tpu.dimension_semantics<parallel>, #tpu.dimension_semantics<arbitrary>], iteration_bounds = array<i64: 2, 2>, scalar_prefetch = 0 : i64, scratch_operands = 1 : i64, tpu.core_type = #tpu.core_type<tc>, window_params = [{transform_indices = @transform_0, window_bounds = array<i64: 1, 64, 64>}, {pipeline_mode = #tpu.pipeline_mode<synchronous>, transform_indices = @transform_1, window_bounds = array<i64: 2, 64, 1>}, {transform_indices = @transform_2, window_bounds = array<i64: 64, 128>}, {transform_indices = @transform_3, window_bounds = array<i64: 64, 128>}]} {
    %c0_i32 = arith.constant 0 : i32
    %0 = arith.cmpi eq, %arg1, %c0_i32 : i32
    %1 = arith.extui %0 : i1 to i32
    %c0_i32_0 = arith.constant 0 : i32
    %2 = arith.cmpi ne, %1, %c0_i32_0 : i32
    scf.if %2 {
      %c0_10 = arith.constant 0 : index
      %c0_11 = arith.constant 0 : index
      %16 = vector.load %arg4[%c0_10, %c0_11] : memref<64x128xf32, #tpu.memory_space<vmem>>, vector<64x128xf32>
      %c0_12 = arith.constant 0 : index
      %c0_13 = arith.constant 0 : index
      %17 = vector.load %arg6[%c0_12, %c0_13] : memref<64x128xf32, #tpu.memory_space<vmem>>, vector<64x128xf32>
      tpu.vector_store %arg6[%c0_12, %c0_13], %16 {strides = array<i32>} : memref<64x128xf32, #tpu.memory_space<vmem>>, vector<64x128xf32>,
    } else {
    }
    %c0 = arith.constant 0 : index
    %c0_1 = arith.constant 0 : index
    %c0_2 = arith.constant 0 : index
    %3 = vector.load %arg2[%c0, %c0_1, %c0_2] : memref<1x64x64xf32, #tpu.memory_space<vmem>>, vector<1x64x64xf32>
    %4 = vector.shape_cast %3 : vector<1x64x64xf32> to vector<64x64xf32>
    %c0_3 = arith.constant 0 : index
    %c0_4 = arith.constant 0 : index
    %5 = vector.load %arg6[%c0_3, %c0_4] : memref<64x128xf32, #tpu.memory_space<vmem>>, vector<64x128xf32>
    %cst = arith.constant dense<0.000000e+00> : vector<64x128xf32>
    %6 = tpu.matmul %4, %5, %cst {dimension_numbers = #tpu.dot_dimension_numbers<[1], [0], [0], [1], [0, 0, 1, 1], [], []>} : vector<64x64xf32>, vector<64x128xf32>, vector<64x128xf32> -> vector<64x128xf32>
    %7 = arith.index_cast %arg1 : i32 to index
    %c0_5 = arith.constant 0 : index
    %c0_6 = arith.constant 0 : index
    %8 = vector.load %arg3[%7, %c0_5, %c0_6] : memref<2x64x1xf32, #tpu.memory_space<vmem>>, vector<1x64x1xf32>
    %9 = vector.shape_cast %8 : vector<1x64x1xf32> to vector<64x1xf32>
    %10 = vector.broadcast %9 : vector<64x1xf32> to vector<64x128xf32>
    %11 = arith.addf %6, %10 : vector<64x128xf32>
    %c0_7 = arith.constant 0 : index
    %c0_8 = arith.constant 0 : index
    %12 = vector.load %arg6[%c0_7, %c0_8] : memref<64x128xf32, #tpu.memory_space<vmem>>, vector<64x128xf32>
    tpu.vector_store %arg6[%c0_7, %c0_8], %11 {strides = array<i32>} : memref<64x128xf32, #tpu.memory_space<vmem>>, vector<64x128xf32>,
    %c1_i32 = arith.constant 1 : i32
    %13 = arith.cmpi eq, %arg1, %c1_i32 : i32
    %14 = arith.extui %13 : i1 to i32
    %c0_i32_9 = arith.constant 0 : i32
    %15 = arith.cmpi ne, %14, %c0_i32_9 : i32
    scf.if %15 {
      %c0_10 = arith.constant 0 : index
      %c0_11 = arith.constant 0 : index
      %16 = vector.load %arg6[%c0_10, %c0_11] : memref<64x128xf32, #tpu.memory_space<vmem>>, vector<64x128xf32>
      %c0_12 = arith.constant 0 : index
      %c0_13 = arith.constant 0 : index
      %17 = vector.load %arg5[%c0_12, %c0_13] : memref<64x128xf32, #tpu.memory_space<vmem>>, vector<64x128xf32>
      tpu.vector_store %arg5[%c0_12, %c0_13], %16 {strides = array<i32>} : memref<64x128xf32, #tpu.memory_space<vmem>>, vector<64x128xf32>,
    } else {
    }
    return
  }
  func.func @transform_0(%arg0: i32, %arg1: i32) -> (i32, i32, i32) {
    %c0_i32 = arith.constant 0 : i32
    %c0_i32_0 = arith.constant 0 : i32
    %c0_i32_1 = arith.constant 0 : i32
    return %arg1, %c0_i32, %c0_i32_0 : i32, i32, i32
  }
  func.func @transform_1(%arg0: i32, %arg1: i32) -> (i32, i32, i32) {
    %c0_i32 = arith.constant 0 : i32
    %c0_i32_0 = arith.constant 0 : i32
    %c0_i32_1 = arith.constant 0 : i32
    %c0_i32_2 = arith.constant 0 : i32
    return %c0_i32, %c0_i32_0, %c0_i32_1 : i32, i32, i32
  }
  func.func @transform_2(%arg0: i32, %arg1: i32) -> (i32, i32) {
    %c0_i32 = arith.constant 0 : i32
    %c0_i32_0 = arith.constant 0 : i32
    return %c0_i32, %arg0 : i32, i32
  }
  func.func @transform_3(%arg0: i32, %arg1: i32) -> (i32, i32) {
    %c0_i32 = arith.constant 0 : i32
    %c0_i32_0 = arith.constant 0 : i32
    return %c0_i32, %arg0 : i32, i32
  }
}

</mosaic_0001>

<bundles_post_ra>
// kernel: tpu_custom_call.1
= control target key start
LH: loop header
LB: loop body
LE: loop exit
PB: predicated region body
PF: predicated region fallthrough
CT: control target
= control target key end

     0   :  { %8 = vsyncpa [#allocation4], 0  ;;  %s999_s0 = inlined_call_operand.vmem [shape: f32[2,64,64], index: 0, kind: input, shape index: {}]   ;;  %s1000_s1 = inlined_call_operand.vmem [shape: f32[2,64,1], index: 1, kind: input, shape index: {}]   ;;  %s1001_s2 = inlined_call_operand.hbm [shape: f32[64,256], index: 2, kind: input, shape index: {}]   ;;  %s1002_s3 = inlined_call_operand.hbm [shape: f32[64,256], index: 3, kind: output, shape index: {}]  }
   0x1   :  { %10 = vsyncpa [#allocation4 + $0x1], 0 }
   0x2   :  { %11 = vsyncpa [#allocation5], 0 }
   0x3   :  { %13 = vsyncpa [#allocation5 + $0x1], 0  ;;  %s811_s12 = smov 0   ;;  %s813_s13 = smov 0  }
   0x4   :  { %s815_s14 = smov 0   ;;  %s817_s15 = smov 0  }
   0x5   :  { %s819_s16 = smov 0   ;;  %s821_s17 = smov 0  }
   0x6   :  { %s823_s18 = smov 0   ;;  %s825_s19 = smov 0  }
   0x7 LB: > { %s515_s20 = sadd.s32 4294967295, %s782_s19   ;;  %s516_s21 = sadd.s32 4294967294, %s782_s19   ;;  %s782_s19 = sphi %s825_s19, %s19_s19   ;;  %s778_s18 = sphi %s823_s18, %s1018_s18   ;;  %s774_s17 = sphi %s821_s17, %s1017_s17   ;;  %s770_s16 = sphi %s819_s16, %s1016_s16   ;;  %s766_s15 = sphi %s817_s15, %s1015_s15   ;;  %s762_s14 = sphi %s815_s14, %s1014_s14   ;;  %s758_s13 = sphi %s813_s13, %s1013_s13   ;;  %s754_s12 = sphi %s811_s12, %s1012_s12  }
   0x8   : > { %s28_s22 = sadd.s32 1, %s774_s17  ;;  %s31_s23 = sadd.s32 1, %s778_s18 }
   0x9   : > { %p29_p0 = scmp.ge.s32.totalorder %s28_s22, 2  ;;  %s85_s24 = sadd.s32 1, %s762_s14 }
   0xa   : > { %p92_p1 = scmp.ne.s32.totalorder %s762_s14, %s758_s13  ;;  %p93_p2 = scmp.eq.s32.totalorder %s782_s19, 0 }
   0xb   : > { %s1020_s22 = smov (%p29_p0, %s28_s22), 0  ;;  %s1022_s23 = smov (!%p29_p0, %s31_s23), %s778_s18 }
   0xc   : > { %1004 = sst [smem:[#allocation9_spill]] %s1020_s22  ;;  %p862_p3 = por %p93_p2, %p92_p1 }
   0xd   : > { %p98_p4 = scmp.ne.s32.totalorder %s758_s13, %s754_s12  ;;  %p33_p5 = scmp.ge.s32.totalorder %s1022_s23, 2 }
   0xe   : > { %p99_p6 = scmp.eq.s32.totalorder %s515_s20, 0  ;;  %p122_p7 = scmp.eq.s32.totalorder %s515_s20, 3 }
   0xf   : > { %p128_p8 = scmp.eq.s32.totalorder %s516_s21, 3  ;;  %s1024_s23 = smov (%p33_p5, %s1022_s23), 0 }
  0x10   : > { %1006 = sst [smem:[#allocation10_spill]] %s1024_s23  ;;  %p870_p9 = por %p99_p6, %p98_p4 }
  0x11   : > { %p874_p10 = por %p122_p7, %p92_p1  ;;  %s82_s28 = ssub.s32 %s778_s18, %s1024_s23 }
  0x12   : > { %p880_p11 = por %p128_p8, %p98_p4  ;;  %p83_p12 = scmp.eq.s32.totalorder %s82_s28, 0 }
  0x13   : > { %p578_p13 = scmp.lt.s32.totalorder %s782_s19, 4  ;;  %s159_s30 = sand.u32 1, %s762_s14  }
  0x14   : > { %s887_s4 = scalar_select %p83_p12, %s762_s14, %s85_s24  }
  0x15   : > { %s519_s5 = sshll.u32 %s159_s30, 6  ;;  %s520_s6 = sshll.u32 %s778_s18, 3 }
  0x16   : > { %s167_s9 = scalar_lea.hbm %s1001_s2, %s520_s6  ;;  %s163_s10 = scalar_lea.vmem [#allocation3], %s519_s5 }
  0x17   : > { %s170_s11 = sshll.u32 %s163_s10, 4  ;;  %s168_s20 = sshll.u32 %s167_s9, 4  ;;  %s171_s11 = int_to_ptr.vmem [resolvable:$true] %s170_s11  ;;  %s169_s20 = int_to_ptr.hbm [resolvable:$true] %s168_s20 }
  0x18   : > { %p571_p0 = pnand %p578_p13, %p862_p3  ;;  %s160_s21 = scalar_lea.sflag [#allocation4], %s159_s30 }
  0x19   : > { %s784_s28 = smov 256   ;;  %s785_s23 = smov 128  }
  0x1a   : > { %s786_s22 = smov 8   ;;  %p521_p1 = scmp.ge.s32.totalorder %s782_s19, 1 }
  0x1b   : > { %573 = dma.hbm_to_vmem [thread:$0]  (!%p571_p0), %s169_s20, 1024, %s171_s11, %s160_s21, %s784_s28, %s785_s23, %s786_s22  }
  0x1c   : > { %p178_p2 = scmp.lt.s32.totalorder %s782_s19, 5 }
  0x1e   : > { %p179_p4 = pnand %p521_p1, %p178_p2 }
  0x1f   : > { %s898_s24 = sand.u32 (!%p179_p4), 1, %s758_s13  }
  0x20   : > { %182 = sbr.rel (%p179_p4) target bundleno = 249 (0xf9), region = 32  ;;  %s522_s5 = sshll.u32 (!%p179_p4), %s898_s24, 6 }
  0x21   : > { %s185_s6 = scalar_lea.sflag (!%p179_p4), [#allocation4], %s898_s24  ;;  %s188_s7 = scalar_lea.vmem (!%p179_p4), [#allocation3], %s522_s5 }
  0x25   : > { %745 = dma.done.wait (%p870_p9), %s185_s6, 1024  }
  0x26   : > { %747 = vsyncadd (%p870_p9), %s185_s6, 4294966272  ;;  %p217_p3 = scmp.lt.s32.totalorder %s766_s15, 1  ;;  %s913_s9 = scalar_lea.vmem [#allocation6], %s522_s5 }
  0x27   : > { %p526_p5 = scmp.ne.s32.totalorder %s766_s15, 0 }
  0x28   : > { %s218_s22 = scalar_select %p217_p3, %s766_s15, 1 }
  0x29   : > { %225 = sbr.rel (%p526_p5) target bundleno = 55 (0x37), region = 40 }
  0x2a   : > { %s541_s23 = sshll.u32 %s218_s22, 6 }
  0x2b   : > { %s911_s8 = scalar_lea.vmem %s999_s0, %s541_s23 }
  0x2e   : > { %v226_v0 = vld [vmem:[%s188_s7] sm:$0xff]  ;;  %v227_v1 = vld [vmem:[%s188_s7 + $0x8] sm:$0xff]  ;;  %v228_v2 = vld [vmem:[%s188_s7 + $0x10] sm:$0xff] }
  0x2f   : > { %234 = vst [vmem:[#allocation2 + $0x30] sm:$0xff] %v226_v0  ;;  %v229_v3 = vld [vmem:[%s188_s7 + $0x18] sm:$0xff]  ;;  %v230_v4 = vld [vmem:[%s188_s7 + $0x20] sm:$0xff]  ;;  %v231_v5 = vld [vmem:[%s188_s7 + $0x28] sm:$0xff] }
  0x30   : > { %235 = vst [vmem:[#allocation2] sm:$0xff] %v227_v1  ;;  %v232_v6 = vld [vmem:[%s188_s7 + $0x30] sm:$0xff]  ;;  %v233_v7 = vld [vmem:[%s188_s7 + $0x38] sm:$0xff] }
  0x31   : > { %236 = vst [vmem:[#allocation2 + $0x18] sm:$0xff] %v228_v2 }
  0x32   : > { %237 = vst [vmem:[#allocation2 + $0x10] sm:$0xff] %v229_v3 }
  0x33   : > { %238 = vst [vmem:[#allocation2 + $0x8] sm:$0xff] %v230_v4 }
  0x34   : > { %239 = vst [vmem:[#allocation2 + $0x20] sm:$0xff] %v231_v5 }
  0x35   : > { %240 = vst [vmem:[#allocation2 + $0x28] sm:$0xff] %v232_v6 }
  0x36   : > { %241 = vst [vmem:[#allocation2 + $0x38] sm:$0xff] %v233_v7 }
  0x37 PF: > { %s527_s26 = sshll.u32 %s766_s15, 6  ;;  %v787_v15 = vmov 0   ;;  %v251_v17 = vld [vmem:[#allocation2] sm:$0xff]  ;;  %v250_v18 = vld [vmem:[#allocation2 + $0x30] sm:$0xff]  ;;  %vm308_vm0 = vcmask 523264   ;;  %v243_v26 = vld [vmem:[%s911_s8 + $0x8] sm:$0xff] }
  0x38   : > { %s920_s20 = scalar_lea.vmem %s1000_s1, %s527_s26  ;;  %652 = vset.pattern.permute.xlu1 %v787_v15  ;;  %651 = vset.pattern.permute.xlu0 %v787_v15  ;;  %v252_v16 = vld [vmem:[#allocation2 + $0x18] sm:$0xff]  ;;  %v242_v19 = vld [vmem:[%s911_s8] sm:$0xff]  ;;  %v244_v20 = vld [vmem:[%s911_s8 + $0x10] sm:$0xff]  ;;  %p536_p6 = scmp.ne.s32.totalorder %s766_s15, 1 }
  0x39   : > { %v262_v12 = vld [vmem:[%s920_s20 + $0x10] sm:$0xff]  ;;  %v260_v13 = vld [vmem:[%s920_s20] sm:$0xff]  ;;  %v263_v23 = vld [vmem:[%s920_s20 + $0x18] sm:$0xff]  ;;  %653 = vset.pattern.permute.xlu2 %v787_v15 }
  0x3a   : > { %v254_v11 = vld [vmem:[#allocation2 + $0x8] sm:$0xff]  ;;  %v253_v14 = vld [vmem:[#allocation2 + $0x10] sm:$0xff]  ;;  %280 = vperm.xlu1 %652, %v262_v12   ;;  %270 = vperm.xlu0 %651, %v260_v13   ;;  %v246_v21 = vld [vmem:[%s911_s8 + $0x20] sm:$0xff] }
  0x3b   : > { %v255_v10 = vld [vmem:[#allocation2 + $0x20] sm:$0xff]  ;;  %v248_v22 = vld [vmem:[%s911_s8 + $0x30] sm:$0xff]  ;;  %v261_v24 = vld [vmem:[%s920_s20 + $0x8] sm:$0xff] }
  0x3c   : > { %v256_v9 = vld [vmem:[#allocation2 + $0x28] sm:$0xff]  ;;  %v264_v25 = vld [vmem:[%s920_s20 + $0x20] sm:$0xff]  ;;  %v245_v27 = vld [vmem:[%s911_s8 + $0x18] sm:$0xff] }
  0x3d   : > { %v257_v8 = vld [vmem:[#allocation2 + $0x38] sm:$0xff]  ;;  %290 = vperm.xlu2 %653, %v264_v25   ;;  %v247_v28 = vld [vmem:[%s911_s8 + $0x28] sm:$0xff]  ;;  %v266_v31 = vld [vmem:[%s920_s20 + $0x30] sm:$0xff] }
  0x3e   : > { %341 = vmatpush.msra.mxu0 %v257_v8  ;;  %542 = vmatpush.msra.mxu1 %v257_v8  ;;  %v249_v29 = vld [vmem:[%s911_s8 + $0x38] sm:$0xff]  ;;  %v265_v32 = vld [vmem:[%s920_s20 + $0x28] sm:$0xff] }
  0x3f   : > { %543 = vmatpush.msra.mxu2 %v257_v8  ;;  %544 = vmatpush.msra.mxu3 %v257_v8  ;;  %v267_v30 = vld [vmem:[%s920_s20 + $0x38] sm:$0xff] }
  0x40   : > { %342 = vmatpush.msra.mxu0 %v256_v9  ;;  %545 = vmatpush.msra.mxu1 %v256_v9 }
  0x41   : > { %546 = vmatpush.msra.mxu2 %v256_v9  ;;  %547 = vmatpush.msra.mxu3 %v256_v9 }
  0x42   : > { %343 = vmatpush.msra.mxu0 %v255_v10  ;;  %548 = vmatpush.msra.mxu1 %v255_v10 }
  0x43   : > { %549 = vmatpush.msra.mxu2 %v255_v10  ;;  %550 = vmatpush.msra.mxu3 %v255_v10 }
  0x44   : > { %344 = vmatpush.msra.mxu0 %v254_v11  ;;  %551 = vmatpush.msra.mxu1 %v254_v11 }
  0x45   : > { %552 = vmatpush.msra.mxu2 %v254_v11  ;;  %553 = vmatpush.msra.mxu3 %v254_v11 }
  0x46   : > { %345 = vmatpush.msra.mxu0 %v253_v14  ;;  %554 = vmatpush.msra.mxu1 %v253_v14 }
  0x47   : > { %555 = vmatpush.msra.mxu2 %v253_v14  ;;  %556 = vmatpush.msra.mxu3 %v253_v14 }
  0x48   : > { %346 = vmatpush.msra.mxu0 %v252_v16  ;;  %557 = vmatpush.msra.mxu1 %v252_v16 }
  0x49   : > { %558 = vmatpush.msra.mxu2 %v252_v16  ;;  %559 = vmatpush.msra.mxu3 %v252_v16 }
  0x4a   : > { %347 = vmatpush.msra.mxu0 %v251_v17  ;;  %560 = vmatpush.msra.mxu1 %v251_v17 }
  0x4b   : > { %561 = vmatpush.msra.mxu2 %v251_v17  ;;  %562 = vmatpush.msra.mxu3 %v251_v17 }
  0x4c   : > { %348 = vmatpush.msra.mxu0 %v250_v18  ;;  %563 = vmatpush.msra.mxu1 %v250_v18 }
  0x4d   : > { %564 = vmatpush.msra.mxu2 %v250_v18  ;;  %565 = vmatpush.msra.mxu3 %v250_v18 }
  0x4e   : > { %528 = vmatmul.msk.f32.vlgmr.msra.gmra.mxu0 %vm308_vm0, %v242_v19  ;;  %530 = vmatmul.msk.f32.vlgmr.msra.gmra.mxu1 %vm308_vm0, %v244_v20 }
  0x4f   : > { %532 = vmatmul.msk.f32.vlgmr.msra.gmra.mxu2 %vm308_vm0, %v246_v21  ;;  %534 = vmatmul.msk.f32.vlgmr.msra.gmra.mxu3 %vm308_vm0, %v248_v22 }
  0x50   : > { %285 = vperm.xlu1 %652, %v263_v23   ;;  %275 = vperm.xlu0 %651, %v261_v24  }
  0x51   : > { %295 = vperm.xlu2 %653, %v265_v32  }
  0x56   : > { %529 = vmatmul.msk.f32.gmra.mxu0 %vm308_vm0, %v243_v26  ;;  %531 = vmatmul.msk.f32.gmra.mxu1 %vm308_vm0, %v245_v27 }
  0x57   : > { %533 = vmatmul.msk.f32.gmra.mxu2 %vm308_vm0, %v247_v28  ;;  %535 = vmatmul.msk.f32.gmra.mxu3 %vm308_vm0, %v249_v29 }
  0x58   : > { %305 = vperm.xlu1 %652, %v267_v30   ;;  %300 = vperm.xlu0 %651, %v266_v31  }
  0x97   : > { %v291_v41 = vpop.permute.xlu2 %290 }
  0xab   : > { %v296_v52 = vpop.permute.xlu2 %295 }
  0xac   : > { %v271_v33 = vpop.permute.xlu0 %270  ;;  %v281_v34 = vpop.permute.xlu1 %280 }
  0xc2   : > { %v276_v35 = vpop.permute.xlu0 %275  ;;  %v286_v40 = vpop.permute.xlu1 %285 }
  0xca   : > { %v301_v42 = vpop.permute.xlu0 %300  ;;  %v306_v51 = vpop.permute.xlu1 %305 }
  0xcb   : > { %v350_v36 = vpop.f32.mrf.mxu0  ;;  %v356_v37 = vpop.f32.mrf.mxu1 }
  0xcc   : > { %v351_v38 = vadd.f32 %v350_v36, %v271_v33  ;;  %v357_v39 = vadd.f32 %v356_v37, %v281_v34 }
  0xce   : > { %374 = vst [vmem:[#allocation2 + $0x30] sm:$0xff] %v351_v38 }
  0xcf   : > { %376 = vst [vmem:[#allocation2 + $0x18] sm:$0xff] %v357_v39 }
  0xd2   : > { %v362_v43 = vpop.f32.mrf.mxu2  ;;  %v368_v44 = vpop.f32.mrf.mxu3 }
  0xd3   : > { %v363_v45 = vadd.f32 %v362_v43, %v291_v41  ;;  %v369_v46 = vadd.f32 %v368_v44, %v301_v42  ;;  %v353_v47 = vpop.f32.mrf.mxu0  ;;  %v359_v48 = vpop.f32.mrf.mxu1 }
  0xd4   : > { %v354_v49 = vadd.f32 %v353_v47, %v276_v35  ;;  %v360_v50 = vadd.f32 %v359_v48, %v286_v40 }
  0xd5   : > { %378 = vst [vmem:[#allocation2 + $0x8] sm:$0xff] %v363_v45 }
  0xd6   : > { %380 = vst [vmem:[#allocation2 + $0x28] sm:$0xff] %v369_v46 }
  0xd7   : > { %375 = vst [vmem:[#allocation2] sm:$0xff] %v354_v49 }
  0xd8   : > { %377 = vst [vmem:[#allocation2 + $0x10] sm:$0xff] %v360_v50 }
  0xda   : > { %v365_v53 = vpop.f32.mrf.mxu2  ;;  %v371_v54 = vpop.f32.mrf.mxu3  ;;  %385 = sbr.rel (%p536_p6) target bundleno = 232 (0xe8), region = 44 }
  0xdb   : > { %v366_v55 = vadd.f32 %v365_v53, %v296_v52  ;;  %v372_v56 = vadd.f32 %v371_v54, %v306_v51 }
  0xdd   : > { %379 = vst [vmem:[#allocation2 + $0x20] sm:$0xff] %v366_v55 }
  0xde   : > { %381 = vst [vmem:[#allocation2 + $0x38] sm:$0xff] %v372_v56 }
  0xdf   : > { %v386_v57 = vld [vmem:[#allocation2 + $0x30] sm:$0xff]  ;;  %v387_v58 = vld [vmem:[#allocation2] sm:$0xff]  ;;  %v388_v59 = vld [vmem:[#allocation2 + $0x18] sm:$0xff] }
  0xe0   : > { %394 = vst [vmem:[%s913_s9] sm:$0xff] %v386_v57  ;;  %v389_v60 = vld [vmem:[#allocation2 + $0x10] sm:$0xff]  ;;  %v390_v61 = vld [vmem:[#allocation2 + $0x8] sm:$0xff] }
  0xe1   : > { %395 = vst [vmem:[%s913_s9 + $0x8] sm:$0xff] %v387_v58  ;;  %v392_v63 = vld [vmem:[#allocation2 + $0x28] sm:$0xff] }
  0xe2   : > { %396 = vst [vmem:[%s913_s9 + $0x10] sm:$0xff] %v388_v59 }
  0xe3   : > { %397 = vst [vmem:[%s913_s9 + $0x18] sm:$0xff] %v389_v60 }
  0xe4   : > { %v391_v62 = vld [vmem:[#allocation2 + $0x20] sm:$0xff]  ;;  %398 = vst [vmem:[%s913_s9 + $0x20] sm:$0xff] %v390_v61 }
  0xe5   : > { %v393_v0 = vld [vmem:[#allocation2 + $0x38] sm:$0xff]  ;;  %399 = vst [vmem:[%s913_s9 + $0x28] sm:$0xff] %v391_v62 }
  0xe6   : > { %400 = vst [vmem:[%s913_s9 + $0x30] sm:$0xff] %v392_v63 }
  0xe7   : > { %401 = vst [vmem:[%s913_s9 + $0x38] sm:$0xff] %v393_v0 }
  0xe8 PF: > { %s538_s15 = sshll.u32 %s770_s16, 3  ;;  %s414_s6 = sshll.u32 %s913_s9, 4  ;;  %s415_s6 = int_to_ptr.vmem [resolvable:$true] %s414_s6 }
  0xe9   : > { %s413_s5 = scalar_lea.hbm %s1002_s3, %s538_s15  ;;  %s403_s22 = scalar_lea.sflag [#allocation5], %s898_s24 }
  0xea   : > { %s416_s7 = sshll.u32 %s413_s5, 4  ;;  %s704_s16 = scalar_lea.hbm %s1002_s3, 128  ;;  %s417_s7 = int_to_ptr.hbm [resolvable:$true] %s416_s7 }
  0xeb   : > { %s698_s23 = sshra.s32 %s417_s7, 4  ;;  %s699_s23 = int_to_ptr.hbm [resolvable:$true] %s698_s23 }
  0xec   : > { %s700_s25 = scalar_lea.hbm %s699_s23, 64  ;;  %p705_p12 = scmp.lt.s32.totalorder %s699_s23, %s1002_s3 }
  0xed   : > { %p701_p7 = scmp.ne.s32.totalorder %s699_s23, %s700_s25  ;;  %p706_p13 = scmp.lt.s32.totalorder %s704_s16, %s700_s25 }
  0xef   : > { %p702_p8 = pnand %p701_p7, %p874_p10  ;;  %p707_p0 = por %p706_p13, %p705_p12 }
  0xf1   : > { %p703_p9 = pneg %p702_p8 }
  0xf3   : > { %p708_p1 = pnand %p707_p0, %p703_p9 }
  0xf5   : > { %711 = shalt.err (!%p708_p1)
}
  0xf6   : > { %s788_s24 = smov 128   ;;  %s789_s9 = smov 256  }
  0xf7   : > { %s790_s11 = smov 8  }
  0xf8   : > { %568 = dma.vmem_to_hbm [thread:$0]  (%p874_p10), %s415_s6, 1024, %s417_s7, %s403_s22, %s788_s24, %s789_s9, %s790_s11  }
  0xf9 PF: > { %p579_p2 = scmp.ge.s32.totalorder %s782_s19, 2  ;;  %s431_s20 = sand.u32 1, %s754_s12  }
  0xfa   : > { %s432_s15 = scalar_lea.sflag [#allocation5], %s431_s20 }
  0xfb   : > { %p575_p4 = pnand %p579_p2, %p880_p11 }
  0xfd   : > { %p576_p3 = pneg %p575_p4 }
  0xff   : > { %749 = dma.done.wait (%p576_p3), %s432_s15, 1024  }
 0x100   : > { %751 = vsyncadd (%p576_p3), %s432_s15, 4294966272  ;;  %s19_s19 = sadd.s32 1, %s782_s19   ;;  %s1010_s27 = sld [smem:[#allocation9_spill]] }
 0x101   : > { %p16_p5 = scmp.ge.s32.totalorder %s19_s19, 6   ;;  %s1011_s21 = sld [smem:[#allocation10_spill]] }
 0x102   : > { %s1012_s12 = smov %s758_s13  ;;  %s1013_s13 = smov %s762_s14 }
 0x103   : > { %s1014_s14 = smov %s887_s4  ;;  %s1015_s15 = smov %s774_s17 }
 0x104   : > { %s1016_s16 = smov %s778_s18  ;;  %18 = sbr.rel (!%p16_p5) target bundleno = 7 (0x7), region = 89 }
 0x106   : > { %s1017_s17 = smov %s1010_s27 }
 0x107   : > { %s1018_s18 = smov %s1011_s21 }
 0x109   :  { %438 = vsyncpa [#allocation4], 1 }
 0x10a   :  { %440 = vsyncpa [#allocation4 + $0x1], 1 }
 0x10b   :  { %441 = vsyncpa [#allocation5], 1 }
 0x10c   :  { %443 = vsyncpa [#allocation5 + $0x1], 1 }

</bundles_post_ra>
